<compile_context>
chip_gen: v5e
topology: v5e:2x2
jax: 0.10.0
libtpu: 0.0.40
codegen_flags: <defaults>
</compile_context>

<pallas_src>
import functools

import jax
import jax.numpy as jnp
from jax.experimental import pallas as pl
from jax.experimental.pallas import tpu as pltpu


def _round_up(x, m):
    return ((x + m - 1) // m) * m


def _nbytes(shape, dtype):
    n = 1
    for s in shape:
        n *= s
    return n * jnp.dtype(dtype).itemsize


def _vmem_capacity_bytes():
    try:
        return int(pltpu.get_tpu_info().vmem_capacity_bytes)
    except Exception:
        return 64 * 1024 * 1024  # conservative fallback (v7x per-TC VMEM)


# --------------------------------------------------------------------------
# Kernels
# --------------------------------------------------------------------------

def _mlp_full_kernel(x_ref, w1_ref, b1_ref, w2_ref, b2_ref, o_ref):
    """Single-pass kernel: whole (padded) I resident, no reduction axis."""
    h = jnp.dot(x_ref[...], w1_ref[...], preferred_element_type=jnp.float32)
    h = h + b1_ref[...].astype(jnp.float32)
    g = jax.nn.gelu(h, approximate=True)  # == torch gelu(approximate='tanh')
    y = jnp.dot(g.astype(w2_ref.dtype), w2_ref[...],
                preferred_element_type=jnp.float32)
    y = y + b2_ref[...].astype(jnp.float32)
    o_ref[...] = y.astype(o_ref.dtype)


def _make_reduce_kernel(acc_in_output):
    """Reduction-over-I kernel; accumulates into o_ref directly for f32 out."""

    def kernel(x_ref, w1_ref, b1_ref, w2_ref, b2_ref, o_ref, *scratch):
        acc_ref = o_ref if acc_in_output else scratch[0]
        j = pl.program_id(1)

        @pl.when(j == 0)
        def _():
            # Fold fc2 bias into the accumulator init.
            acc_ref[...] = jnp.broadcast_to(
                b2_ref[...].astype(acc_ref.dtype), acc_ref.shape)

        h = jnp.dot(x_ref[...], w1_ref[...], preferred_element_type=jnp.float32)
        h = h + b1_ref[...].astype(jnp.float32)
        g = jax.nn.gelu(h, approximate=True)
        acc_ref[...] += jnp.dot(
            g.astype(w2_ref.dtype), w2_ref[...],
            preferred_element_type=jnp.float32).astype(acc_ref.dtype)

        if not acc_in_output:
            @pl.when(j == pl.num_programs(1) - 1)
            def _():
                o_ref[...] = acc_ref[...].astype(o_ref.dtype)

    return kernel


# --------------------------------------------------------------------------
# Wrapper
# --------------------------------------------------------------------------

@functools.partial(jax.jit, static_argnames=("block_m", "block_i", "compute_dtype"))
def siglip_mlp(hidden_states, w1, b1, w2, b2, *, block_m=512, block_i=None,
               compute_dtype=None):
    """hidden_states: (B, S, H); w1: (H, I); b1: (I,); w2: (I, H); b2: (H,)."""
    out_dtype = hidden_states.dtype
    B, S, H = hidden_states.shape
    I = w1.shape[1]
    M = B * S

    if compute_dtype is not None:
        hidden_states = hidden_states.astype(compute_dtype)
        w1 = w1.astype(compute_dtype)
        w2 = w2.astype(compute_dtype)

    x2d = hidden_states.reshape(M, H)
    xdt, wdt = x2d.dtype, w1.dtype
    acc_in_output = jnp.dtype(out_dtype) == jnp.dtype(jnp.float32)

    # ---- VMEM budget: per-generation capacity minus headroom for Mosaic
    # internal scratch (≈112 MiB on v5e/v6e, ≈56 MiB on v7x).
    vmem_cap = _vmem_capacity_bytes()
    budget = vmem_cap - max(8 * 1024 * 1024, vmem_cap // 8)

    # ---- Row (M) tiling: large, 16-aligned tiles; pad instead of asserting.
    tm = min(block_m, _round_up(M, 16))
    tm = max(16, _round_up(tm, 16))
    # v7x megacore: prefer >= 2 row tiles so the "parallel" M axis shards
    # across both TensorCores (v5e/v6e are single-TC; this is harmless there).
    if _round_up(M, tm) // tm < 2 and M > 256:
        tm = _round_up((M + 1) // 2, 16)

    # ---- Intermediate (I) dim: always pad to a multiple of 128 (exact:
    # gelu(0) == 0 and the padded fc2 rows are zero).
    Ip = _round_up(I, 128)

    # ---- VMEM estimates (double-buffered tiles + accumulator + f32
    # gelu/matmul temporaries headroom).
    def est_full(tm_):
        return (2 * (_nbytes((tm_, H), xdt) + _nbytes((H, Ip), wdt)
                     + _nbytes((1, Ip), b1.dtype) + _nbytes((Ip, H), wdt)
                     + _nbytes((1, H), b2.dtype) + _nbytes((tm_, H), out_dtype))
                + 3 * _nbytes((tm_, Ip), jnp.float32))

    def est_reduce(tm_, bi_):
        acc = 0 if acc_in_output else _nbytes((tm_, H), jnp.float32)
        return (2 * (_nbytes((tm_, H), xdt) + _nbytes((H, bi_), wdt)
                     + _nbytes((1, bi_), b1.dtype) + _nbytes((bi_, H), wdt)
                     + _nbytes((1, H), b2.dtype) + _nbytes((tm_, H), out_dtype))
                + acc + 3 * _nbytes((tm_, bi_), jnp.float32))

    # ---- bi candidates: exact divisors of Ip that are multiples of 128.
    n128 = Ip // 128
    bi_cands = [d * 128 for d in range(n128, 0, -1) if n128 % d == 0]
    if block_i is not None:
        cap = max(128, block_i)
        bi_cands = [b for b in bi_cands if b <= cap] or [128]
    allow_full = (block_i is None) or (block_i >= Ip)

    # ---- Tile/mode selection: prefer full-I residency, else the largest
    # exact-divisor bi that fits; shrink tm only if nothing fits.
    tm_cands, t = [], tm
    while t >= 16:
        tm_cands.append(t)
        if t <= 128:
            break
        nt = max(128, _round_up(t // 2, 16))
        if nt >= t:
            break
        t = nt

    sel = None
    for t in tm_cands:
        if allow_full and est_full(t) <= budget:
            sel = ("full", t, Ip)
            break
        fit = [b for b in bi_cands if est_reduce(t, b) <= budget]
        if fit:
            sel = ("reduce", t, fit[0])
            break
    if sel is None:
        sel = ("reduce", tm_cands[-1], bi_cands[-1])
    mode, tm, bi = sel

    # ---- Zero-padding (exact; padded M rows are sliced off at the end).
    Mp = _round_up(M, tm)
    if Mp != M:
        x2d = jnp.pad(x2d, ((0, Mp - M), (0, 0)))
    if Ip != I:
        w1 = jnp.pad(w1, ((0, 0), (0, Ip - I)))
        b1 = jnp.pad(b1, ((0, Ip - I),))
        w2 = jnp.pad(w2, ((0, Ip - I), (0, 0)))
    b1r = b1.reshape(1, Ip)
    b2r = b2.reshape(1, H)

    vmem_limit = max(budget, 32 * 1024 * 1024)
    cost = pl.CostEstimate(
        flops=4 * M * H * I,
        transcendentals=M * I,
        bytes_accessed=(_nbytes((Mp, H), xdt) + _nbytes((H, Ip), wdt)
                        + _nbytes((Ip, H), wdt) + _nbytes((1, Ip), b1r.dtype)
                        + _nbytes((1, H), b2r.dtype) + _nbytes((Mp, H), out_dtype)),
    )

    if mode == "full":
        # Weights/biases are grid-invariant: DMA'd once, resident for all M tiles.
        # TODO(synk): pipeline_mode=pl.Buffered(1) on the weight specs would drop
        # their unused second pipeline buffer and halve resident weight VMEM.
        out2d = pl.pallas_call(
            _mlp_full_kernel,
            out_shape=jax.ShapeDtypeStruct((Mp, H), out_dtype),
            grid_spec=pltpu.PrefetchScalarGridSpec(
                num_scalar_prefetch=0,
                grid=(Mp // tm,),
                in_specs=[
                    pl.BlockSpec((tm, H), lambda i: (i, 0)),   # x row tile
                    pl.BlockSpec((H, Ip), lambda i: (0, 0)),   # w1 (resident)
                    pl.BlockSpec((1, Ip), lambda i: (0, 0)),   # b1 (resident)
                    pl.BlockSpec((Ip, H), lambda i: (0, 0)),   # w2 (resident)
                    pl.BlockSpec((1, H), lambda i: (0, 0)),    # b2 (resident)
                ],
                out_specs=pl.BlockSpec((tm, H), lambda i: (i, 0)),
            ),
            compiler_params=pltpu.CompilerParams(
                dimension_semantics=("parallel",),
                vmem_limit_bytes=vmem_limit,
            ),
            cost_estimate=cost,
        )(x2d, w1, b1r, w2, b2r)
    else:
        kernel = _make_reduce_kernel(acc_in_output)
        scratch = [] if acc_in_output else [pltpu.VMEM((tm, H), jnp.float32)]
        out2d = pl.pallas_call(
            kernel,
            out_shape=jax.ShapeDtypeStruct((Mp, H), out_dtype),
            grid_spec=pltpu.PrefetchScalarGridSpec(
                num_scalar_prefetch=0,
                grid=(Mp // tm, Ip // bi),
                in_specs=[
                    pl.BlockSpec((tm, H), lambda i, j: (i, 0)),  # x row tile
                    pl.BlockSpec((H, bi), lambda i, j: (0, j)),  # w1 col tile
                    pl.BlockSpec((1, bi), lambda i, j: (0, j)),  # b1 tile
                    pl.BlockSpec((bi, H), lambda i, j: (j, 0)),  # w2 row tile
                    pl.BlockSpec((1, H), lambda i, j: (0, 0)),   # b2
                ],
                out_specs=pl.BlockSpec((tm, H), lambda i, j: (i, 0)),
                scratch_shapes=scratch,
            ),
            compiler_params=pltpu.CompilerParams(
                dimension_semantics=("parallel", "arbitrary"),
                vmem_limit_bytes=vmem_limit,
            ),
            cost_estimate=cost,
        )(x2d, w1, b1r, w2, b2r)

    return out2d[:M].reshape(B, S, H)


def _reference_mlp(x, w1, b1, w2, b2):
    h = x @ w1 + b1
    g = jax.nn.gelu(h, approximate=True)
    return g @ w2 + b2


if __name__ == "__main__":
    # Small, lane-aligned demo config: batch=2, seq=8, hidden=128, intermediate=256.
    B, S, H, I = 2, 8, 128, 256

    key = jax.random.PRNGKey(0)
    k_x, k_w1, k_b1, k_w2, k_b2 = jax.random.split(key, 5)

    x = jax.random.normal(k_x, (B, S, H), dtype=jnp.float32)
    # torch.nn.Linear stores (out, in); weights here are pre-transposed (in, out).
    w1 = jax.random.normal(k_w1, (H, I), dtype=jnp.float32) * (1.0 / jnp.sqrt(H))
    b1 = jax.random.normal(k_b1, (I,), dtype=jnp.float32) * 0.01
    w2 = jax.random.normal(k_w2, (I, H), dtype=jnp.float32) * (1.0 / jnp.sqrt(I))
    b2 = jax.random.normal(k_b2, (H,), dtype=jnp.float32) * 0.01

    ref = _reference_mlp(x, w1, b1, w2, b2)

    # 1) Auto path: full-I resident weights, single pass, no reduction axis.
    out = jax.block_until_ready(siglip_mlp(x, w1, b1, w2, b2))
    assert out.shape == (B, S, H)
    assert jnp.allclose(out, ref, atol=2e-4, rtol=2e-4), "mismatch (full-I path)"

    # 2) I-reduction path; f32 output accumulates directly in o_ref (no scratch).
    out_red = jax.block_until_ready(siglip_mlp(x, w1, b1, w2, b2, block_i=128))
    assert jnp.allclose(out_red, ref, atol=2e-4, rtol=2e-4), "mismatch (I-tiled)"

    # 3) bf16 compute path (production recommendation), f32 output.
    out_bf16 = jax.block_until_ready(
        siglip_mlp(x, w1, b1, w2, b2, compute_dtype=jnp.bfloat16))
    assert jnp.allclose(out_bf16, ref, atol=8e-2, rtol=8e-2), "mismatch (bf16 compute)"

    # 4) bf16 model dtype + I-reduction path (exercises the f32 scratch accumulator).
    out_bf16_red = jax.block_until_ready(
        siglip_mlp(x.astype(jnp.bfloat16), w1.astype(jnp.bfloat16), b1,
                   w2.astype(jnp.bfloat16), b2, block_i=128))
    assert jnp.allclose(out_bf16_red.astype(jnp.float32), ref,
                        atol=1e-1, rtol=1e-1), "mismatch (bf16 I-tiled)"

    print("KERNEL_OK")
</pallas_src>

<mosaic_0001>
module attributes {stable_mosaic.version = 11 : i64} {
  func.func @_mlp_full_kernel(%arg0: i32, %arg1: memref<16x128xf32, #tpu.memory_space<vmem>>, %arg2: memref<128x256xf32, #tpu.memory_space<vmem>>, %arg3: memref<1x256xf32, #tpu.memory_space<vmem>>, %arg4: memref<256x128xf32, #tpu.memory_space<vmem>>, %arg5: memref<1x128xf32, #tpu.memory_space<vmem>>, %arg6: memref<16x128xf32, #tpu.memory_space<vmem>>) attributes {dimension_semantics = [#tpu.dimension_semantics<parallel>], iteration_bounds = array<i64: 1>, scalar_prefetch = 0 : i64, scratch_operands = 0 : i64, tpu.core_type = #tpu.core_type<tc>, window_params = [{transform_indices = @transform_0, window_bounds = array<i64: 16, 128>}, {pipeline_mode = #tpu.pipeline_mode<synchronous>, transform_indices = @transform_1, window_bounds = array<i64: 128, 256>}, {pipeline_mode = #tpu.pipeline_mode<synchronous>, transform_indices = @transform_2, window_bounds = array<i64: 1, 256>}, {pipeline_mode = #tpu.pipeline_mode<synchronous>, transform_indices = @transform_3, window_bounds = array<i64: 256, 128>}, {pipeline_mode = #tpu.pipeline_mode<synchronous>, transform_indices = @transform_4, window_bounds = array<i64: 1, 128>}, {transform_indices = @transform_5, window_bounds = array<i64: 16, 128>}]} {
    %c0 = arith.constant 0 : index
    %c0_0 = arith.constant 0 : index
    %0 = vector.load %arg1[%c0, %c0_0] : memref<16x128xf32, #tpu.memory_space<vmem>>, vector<16x128xf32>
    %c0_1 = arith.constant 0 : index
    %c0_2 = arith.constant 0 : index
    %1 = vector.load %arg2[%c0_1, %c0_2] : memref<128x256xf32, #tpu.memory_space<vmem>>, vector<128x256xf32>
    %cst = arith.constant dense<0.000000e+00> : vector<16x256xf32>
    %2 = tpu.matmul %0, %1, %cst {dimension_numbers = #tpu.dot_dimension_numbers<[1], [0], [0], [1], [0, 0, 1, 1], [], []>} : vector<16x128xf32>, vector<128x256xf32>, vector<16x256xf32> -> vector<16x256xf32>
    %c0_3 = arith.constant 0 : index
    %c0_4 = arith.constant 0 : index
    %3 = vector.load %arg3[%c0_3, %c0_4] : memref<1x256xf32, #tpu.memory_space<vmem>>, vector<1x256xf32>
    %4 = vector.broadcast %3 : vector<1x256xf32> to vector<16x256xf32>
    %5 = arith.addf %2, %4 : vector<16x256xf32>
    %6 = arith.mulf %5, %5 : vector<16x256xf32>
    %7 = arith.mulf %5, %6 : vector<16x256xf32>
    %cst_5 = arith.constant 4.471500e-02 : f32
    %8 = vector.broadcast %cst_5 : f32 to vector<16x256xf32>
    %9 = arith.mulf %8, %7 : vector<16x256xf32>
    %10 = arith.addf %5, %9 : vector<16x256xf32>
    %cst_6 = arith.constant 0.797884583 : f32
    %11 = vector.broadcast %cst_6 : f32 to vector<16x256xf32>
    %12 = arith.mulf %11, %10 : vector<16x256xf32>
    %13 = math.tanh %12 : vector<16x256xf32>
    %cst_7 = arith.constant 1.000000e+00 : f32
    %14 = vector.broadcast %cst_7 : f32 to vector<16x256xf32>
    %15 = arith.addf %14, %13 : vector<16x256xf32>
    %cst_8 = arith.constant 5.000000e-01 : f32
    %16 = vector.broadcast %cst_8 : f32 to vector<16x256xf32>
    %17 = arith.mulf %16, %15 : vector<16x256xf32>
    %18 = arith.mulf %5, %17 : vector<16x256xf32>
    %c0_9 = arith.constant 0 : index
    %c0_10 = arith.constant 0 : index
    %19 = vector.load %arg4[%c0_9, %c0_10] : memref<256x128xf32, #tpu.memory_space<vmem>>, vector<256x128xf32>
    %cst_11 = arith.constant dense<0.000000e+00> : vector<16x128xf32>
    %20 = tpu.matmul %18, %19, %cst_11 {dimension_numbers = #tpu.dot_dimension_numbers<[1], [0], [0], [1], [0, 0, 1, 1], [], []>} : vector<16x256xf32>, vector<256x128xf32>, vector<16x128xf32> -> vector<16x128xf32>
    %c0_12 = arith.constant 0 : index
    %c0_13 = arith.constant 0 : index
    %21 = vector.load %arg5[%c0_12, %c0_13] : memref<1x128xf32, #tpu.memory_space<vmem>>, vector<1x128xf32>
    %22 = vector.broadcast %21 : vector<1x128xf32> to vector<16x128xf32>
    %23 = arith.addf %20, %22 : vector<16x128xf32>
    %c0_14 = arith.constant 0 : index
    %c0_15 = arith.constant 0 : index
    %24 = vector.load %arg6[%c0_14, %c0_15] : memref<16x128xf32, #tpu.memory_space<vmem>>, vector<16x128xf32>
    tpu.vector_store %arg6[%c0_14, %c0_15], %23 {strides = array<i32>} : memref<16x128xf32, #tpu.memory_space<vmem>>, vector<16x128xf32>,
    return
  }
  func.func @transform_0(%arg0: i32) -> (i32, i32) {
    %c0_i32 = arith.constant 0 : i32
    %c0_i32_0 = arith.constant 0 : i32
    return %arg0, %c0_i32 : i32, i32
  }
  func.func @transform_1(%arg0: i32) -> (i32, i32) {
    %c0_i32 = arith.constant 0 : i32
    %c0_i32_0 = arith.constant 0 : i32
    %c0_i32_1 = arith.constant 0 : i32
    return %c0_i32, %c0_i32_0 : i32, i32
  }
  func.func @transform_2(%arg0: i32) -> (i32, i32) {
    %c0_i32 = arith.constant 0 : i32
    %c0_i32_0 = arith.constant 0 : i32
    %c0_i32_1 = arith.constant 0 : i32
    return %c0_i32, %c0_i32_0 : i32, i32
  }
  func.func @transform_3(%arg0: i32) -> (i32, i32) {
    %c0_i32 = arith.constant 0 : i32
    %c0_i32_0 = arith.constant 0 : i32
    %c0_i32_1 = arith.constant 0 : i32
    return %c0_i32, %c0_i32_0 : i32, i32
  }
  func.func @transform_4(%arg0: i32) -> (i32, i32) {
    %c0_i32 = arith.constant 0 : i32
    %c0_i32_0 = arith.constant 0 : i32
    %c0_i32_1 = arith.constant 0 : i32
    return %c0_i32, %c0_i32_0 : i32, i32
  }
  func.func @transform_5(%arg0: i32) -> (i32, i32) {
    %c0_i32 = arith.constant 0 : i32
    %c0_i32_0 = arith.constant 0 : i32
    return %arg0, %c0_i32 : i32, i32
  }
}

</mosaic_0001>

<bundles_post_ra>
// kernel: siglip_mlp.1
= control target key start
LH: loop header
LB: loop body
LE: loop exit
PB: predicated region body
PF: predicated region fallthrough
CT: control target
= control target key end

     0   :  { %10 = vsyncpa [#allocation3], 0  ;;  %s478_s0 = inlined_call_operand.hbm [shape: f32[16,128], index: 0, kind: input, shape index: {}]   ;;  %s479_s1 = inlined_call_operand.hbm [shape: f32[128,256], index: 1, kind: input, shape index: {}]   ;;  %s480_s2 = inlined_call_operand.vmem [shape: f32[1,256], index: 2, kind: input, shape index: {}]   ;;  %s481_s3 = inlined_call_operand.hbm [shape: f32[256,128], index: 3, kind: input, shape index: {}]   ;;  %s482_s4 = inlined_call_operand.vmem [shape: f32[1,128], index: 4, kind: input, shape index: {}]   ;;  %s483_s5 = inlined_call_operand.hbm [shape: f32[16,128], index: 5, kind: output, shape index: {}]  }
   0x1   :  { %11 = vsyncpa [#allocation6], 0  ;;  %s30_s20 = sshll.u32 %s479_s1, 4  ;;  %s31_s20 = int_to_ptr.hbm [resolvable:$true] %s30_s20 }
   0x2   :  { %12 = vsyncpa [#allocation4], 0  ;;  %s413_s21 = smov [#allocation5]   ;;  %s17_s25 = sshll.u32 %s478_s0, 4  ;;  %s18_s25 = int_to_ptr.hbm [resolvable:$true] %s17_s25 }
   0x3   :  { %s32_s22 = sshll.u32 %s413_s21, 4  ;;  %s414_s26 = smov 256   ;;  %s33_s22 = int_to_ptr.vmem [resolvable:$true] %s32_s22 }
   0x4   :  { %s415_s27 = smov 16   ;;  %s416_s28 = smov [#allocation2]  }
   0x5   :  { %38 = dma.hbm_to_vmem [thread:$0]  %s31_s20, 4096, %s33_s22, [#allocation6], %s414_s26, %s414_s26, %s415_s27  }
   0x6   :  { %s19_s29 = sshll.u32 %s416_s28, 4  ;;  %s417_s30 = smov 128   ;;  %s20_s29 = int_to_ptr.vmem [resolvable:$true] %s19_s29 }
   0x7   :  { %s418_s6 = smov 8   ;;  %s45_s8 = sshll.u32 %s481_s3, 4  ;;  %s46_s8 = int_to_ptr.hbm [resolvable:$true] %s45_s8 }
   0x8   :  { %25 = dma.hbm_to_vmem [thread:$0]  %s18_s25, 256, %s20_s29, [#allocation3], %s417_s30, %s417_s30, %s418_s6  }
   0x9   :  { %s419_s9 = smov [#allocation7]  }
   0xa   :  { %s47_s0 = sshll.u32 %s419_s9, 4  ;;  %s48_s0 = int_to_ptr.vmem [resolvable:$true] %s47_s0 }
   0xb   :  { %53 = dma.hbm_to_vmem [thread:$0]  %s46_s8, 4096, %s48_s0, [#allocation6], %s417_s30, %s417_s30, %s418_s6  }
   0xc   :  { %407 = dma.done.wait [#allocation3], 256  }
   0xd   :  { %408 = vsyncadd [#allocation3], 4294967040 }
   0xe   :  { %409 = dma.done.wait [#allocation6], 8192  }
   0xf   :  { %410 = vsyncadd [#allocation6], 4294959104  ;;  %v100_v0 = vld [vmem:[#allocation5 + $0xf0] sm:$0xff]  ;;  %v101_v1 = vld [vmem:[#allocation5 + $0xf8] sm:$0xff]  ;;  %s420_s12 = smov [#allocation8]   ;;  %s280_s16 = sshll.u32 %s483_s5, 4  ;;  %s281_s16 = int_to_ptr.hbm [resolvable:$true] %s280_s16 }
  0x10   :  { %v98_v2 = vld [vmem:[#allocation5 + $0xe0] sm:$0xff]  ;;  %108 = vmatpush.msra.mxu0 %v100_v0  ;;  %131 = vmatpush.msra.mxu1 %v101_v1  ;;  %v99_v3 = vld [vmem:[#allocation5 + $0xe8] sm:$0xff]  ;;  %v96_v4 = vld [vmem:[#allocation5 + $0xd0] sm:$0xff]  ;;  %s278_s13 = sshll.u32 %s420_s12, 4  ;;  %s279_s13 = int_to_ptr.vmem [resolvable:$true] %s278_s13 }
  0x11   :  { %v97_v5 = vld [vmem:[#allocation5 + $0xd8] sm:$0xff]  ;;  %v94_v6 = vld [vmem:[#allocation5 + $0xc0] sm:$0xff]  ;;  %v95_v7 = vld [vmem:[#allocation5 + $0xc8] sm:$0xff] }
  0x12   :  { %109 = vmatpush.msra.mxu0 %v98_v2  ;;  %132 = vmatpush.msra.mxu1 %v99_v3  ;;  %v92_v8 = vld [vmem:[#allocation5 + $0xb0] sm:$0xff]  ;;  %v93_v9 = vld [vmem:[#allocation5 + $0xb8] sm:$0xff]  ;;  %v90_v10 = vld [vmem:[#allocation5 + $0xa0] sm:$0xff] }
  0x13   :  { %v91_v11 = vld [vmem:[#allocation5 + $0xa8] sm:$0xff]  ;;  %v88_v12 = vld [vmem:[#allocation5 + $0x90] sm:$0xff]  ;;  %v89_v13 = vld [vmem:[#allocation5 + $0x98] sm:$0xff] }
  0x14   :  { %110 = vmatpush.msra.mxu0 %v96_v4  ;;  %133 = vmatpush.msra.mxu1 %v97_v5  ;;  %v86_v14 = vld [vmem:[#allocation5 + $0x80] sm:$0xff]  ;;  %v205_v15 = vld [vmem:[#allocation7 + $0x78] sm:$0xff]  ;;  %v87_v17 = vld [vmem:[#allocation5 + $0x88] sm:$0xff] }
  0x15   :  { %v221_v16 = vld [vmem:[#allocation7 + $0xf8] sm:$0xff]  ;;  %226 = vmatpush.msra.mxu2 %v205_v15  ;;  %v204_v18 = vld [vmem:[#allocation7 + $0x70] sm:$0xff]  ;;  %v203_v20 = vld [vmem:[#allocation7 + $0x68] sm:$0xff] }
  0x16   :  { %111 = vmatpush.msra.mxu0 %v94_v6  ;;  %134 = vmatpush.msra.mxu1 %v95_v7  ;;  %v220_v19 = vld [vmem:[#allocation7 + $0xf0] sm:$0xff]  ;;  %v219_v21 = vld [vmem:[#allocation7 + $0xe8] sm:$0xff]  ;;  %v85_v23 = vld [vmem:[#allocation5 + $0x78] sm:$0xff] }
  0x17   :  { %249 = vmatpush.msra.mxu3 %v221_v16  ;;  %v84_v22 = vld [vmem:[#allocation5 + $0x70] sm:$0xff]  ;;  %227 = vmatpush.msra.mxu2 %v204_v18  ;;  %v82_v24 = vld [vmem:[#allocation5 + $0x60] sm:$0xff]  ;;  %v83_v25 = vld [vmem:[#allocation5 + $0x68] sm:$0xff] }
  0x18   :  { %112 = vmatpush.msra.mxu0 %v92_v8  ;;  %135 = vmatpush.msra.mxu1 %v93_v9  ;;  %v80_v26 = vld [vmem:[#allocation5 + $0x50] sm:$0xff]  ;;  %v81_v27 = vld [vmem:[#allocation5 + $0x58] sm:$0xff]  ;;  %v78_v28 = vld [vmem:[#allocation5 + $0x40] sm:$0xff] }
  0x19   :  { %250 = vmatpush.msra.mxu3 %v220_v19  ;;  %228 = vmatpush.msra.mxu2 %v203_v20  ;;  %v79_v29 = vld [vmem:[#allocation5 + $0x48] sm:$0xff]  ;;  %v76_v30 = vld [vmem:[#allocation5 + $0x30] sm:$0xff]  ;;  %v77_v31 = vld [vmem:[#allocation5 + $0x38] sm:$0xff] }
  0x1a   :  { %113 = vmatpush.msra.mxu0 %v90_v10  ;;  %136 = vmatpush.msra.mxu1 %v91_v11  ;;  %v74_v32 = vld [vmem:[#allocation5 + $0x20] sm:$0xff]  ;;  %v75_v33 = vld [vmem:[#allocation5 + $0x28] sm:$0xff]  ;;  %v72_v34 = vld [vmem:[#allocation5 + $0x10] sm:$0xff] }
  0x1b   :  { %251 = vmatpush.msra.mxu3 %v219_v21  ;;  %v73_v35 = vld [vmem:[#allocation5 + $0x18] sm:$0xff]  ;;  %v70_v36 = vld [vmem:[#allocation5] sm:$0xff]  ;;  %v71_v37 = vld [vmem:[#allocation5 + $0x8] sm:$0xff] }
  0x1c   :  { %114 = vmatpush.msra.mxu0 %v88_v12  ;;  %137 = vmatpush.msra.mxu1 %v89_v13  ;;  %v68_v38 = vld [vmem:[#allocation2] sm:$0xff]  ;;  %v69_v39 = vld [vmem:[#allocation2 + $0x8] sm:$0xff]  ;;  %v202_v40 = vld [vmem:[#allocation7 + $0x60] sm:$0xff] }
  0x1d   :  { %v218_v41 = vld [vmem:[#allocation7 + $0xe0] sm:$0xff]  ;;  %229 = vmatpush.msra.mxu2 %v202_v40  ;;  %v201_v42 = vld [vmem:[#allocation7 + $0x58] sm:$0xff]  ;;  %v200_v44 = vld [vmem:[#allocation7 + $0x50] sm:$0xff] }
  0x1e   :  { %115 = vmatpush.msra.mxu0 %v86_v14  ;;  %138 = vmatpush.msra.mxu1 %v87_v17  ;;  %v217_v43 = vld [vmem:[#allocation7 + $0xd8] sm:$0xff]  ;;  %v216_v45 = vld [vmem:[#allocation7 + $0xd0] sm:$0xff]  ;;  %v199_v46 = vld [vmem:[#allocation7 + $0x48] sm:$0xff] }
  0x1f   :  { %252 = vmatpush.msra.mxu3 %v218_v41  ;;  %230 = vmatpush.msra.mxu2 %v201_v42  ;;  %v215_v47 = vld [vmem:[#allocation7 + $0xc8] sm:$0xff]  ;;  %v198_v48 = vld [vmem:[#allocation7 + $0x40] sm:$0xff]  ;;  %v197_v50 = vld [vmem:[#allocation7 + $0x38] sm:$0xff] }
  0x20   :  { %116 = vmatpush.msra.mxu0 %v84_v22  ;;  %139 = vmatpush.msra.mxu1 %v85_v23  ;;  %v214_v49 = vld [vmem:[#allocation7 + $0xc0] sm:$0xff]  ;;  %v213_v51 = vld [vmem:[#allocation7 + $0xb8] sm:$0xff]  ;;  %v196_v52 = vld [vmem:[#allocation7 + $0x30] sm:$0xff] }
  0x21   :  { %253 = vmatpush.msra.mxu3 %v217_v43  ;;  %231 = vmatpush.msra.mxu2 %v200_v44  ;;  %v212_v53 = vld [vmem:[#allocation7 + $0xb0] sm:$0xff]  ;;  %v195_v54 = vld [vmem:[#allocation7 + $0x28] sm:$0xff]  ;;  %v194_v56 = vld [vmem:[#allocation7 + $0x20] sm:$0xff] }
  0x22   :  { %117 = vmatpush.msra.mxu0 %v82_v24  ;;  %140 = vmatpush.msra.mxu1 %v83_v25  ;;  %v211_v55 = vld [vmem:[#allocation7 + $0xa8] sm:$0xff]  ;;  %v210_v57 = vld [vmem:[#allocation7 + $0xa0] sm:$0xff]  ;;  %v193_v58 = vld [vmem:[#allocation7 + $0x18] sm:$0xff] }
  0x23   :  { %254 = vmatpush.msra.mxu3 %v216_v45  ;;  %232 = vmatpush.msra.mxu2 %v199_v46  ;;  %v209_v59 = vld [vmem:[#allocation7 + $0x98] sm:$0xff]  ;;  %v192_v60 = vld [vmem:[#allocation7 + $0x10] sm:$0xff]  ;;  %v191_v62 = vld [vmem:[#allocation7 + $0x8] sm:$0xff] }
  0x24   :  { %118 = vmatpush.msra.mxu0 %v80_v26  ;;  %141 = vmatpush.msra.mxu1 %v81_v27  ;;  %v208_v61 = vld [vmem:[#allocation7 + $0x90] sm:$0xff]  ;;  %v207_v63 = vld [vmem:[#allocation7 + $0x88] sm:$0xff]  ;;  %v190_v0 = vld [vmem:[#allocation7] sm:$0xff] }
  0x25   :  { %255 = vmatpush.msra.mxu3 %v215_v47  ;;  %233 = vmatpush.msra.mxu2 %v198_v48  ;;  %v206_v1 = vld [vmem:[#allocation7 + $0x80] sm:$0xff]  ;;  %v102_v2 = vld [vmem:[%s480_s2] sm:$0x3] }
  0x26   :  { %119 = vmatpush.msra.mxu0 %v78_v28  ;;  %142 = vmatpush.msra.mxu1 %v79_v29  ;;  %v104_v3 = vperm.slane %v102_v2, 0  ;;  %v105_v4 = vperm.slane %v102_v2, 1 }
  0x27   :  { %256 = vmatpush.msra.mxu3 %v214_v49  ;;  %234 = vmatpush.msra.mxu2 %v197_v50  ;;  %v302_v49 = vld [vmem:[%s482_s4] ss:$0 sm:$0xff] }
  0x28   :  { %120 = vmatpush.msra.mxu0 %v76_v30  ;;  %143 = vmatpush.msra.mxu1 %v77_v31 }
  0x29   :  { %257 = vmatpush.msra.mxu3 %v213_v51  ;;  %235 = vmatpush.msra.mxu2 %v196_v52 }
  0x2a   :  { %121 = vmatpush.msra.mxu0 %v74_v32  ;;  %144 = vmatpush.msra.mxu1 %v75_v33 }
  0x2b   :  { %258 = vmatpush.msra.mxu3 %v212_v53  ;;  %236 = vmatpush.msra.mxu2 %v195_v54 }
  0x2c   :  { %122 = vmatpush.msra.mxu0 %v72_v34  ;;  %145 = vmatpush.msra.mxu1 %v73_v35 }
  0x2d   :  { %259 = vmatpush.msra.mxu3 %v211_v55  ;;  %237 = vmatpush.msra.mxu2 %v194_v56 }
  0x2e   :  { %123 = vmatpush.msra.mxu0 %v70_v36  ;;  %146 = vmatpush.msra.mxu1 %v71_v37 }
  0x2f   :  { %124 = vmatmul.f32.vlgmr.msra.gmra.mxu0 %v68_v38  ;;  %147 = vmatmul.f32.vlgmr.msra.gmra.mxu1 %v68_v38 }
  0x30   :  { %260 = vmatpush.msra.mxu3 %v210_v57  ;;  %238 = vmatpush.msra.mxu2 %v193_v58 }
  0x32   :  { %261 = vmatpush.msra.mxu3 %v209_v59  ;;  %239 = vmatpush.msra.mxu2 %v192_v60 }
  0x34   :  { %262 = vmatpush.msra.mxu3 %v208_v61  ;;  %240 = vmatpush.msra.mxu2 %v191_v62 }
  0x36   :  { %263 = vmatpush.msra.mxu3 %v207_v63  ;;  %241 = vmatpush.msra.mxu2 %v190_v0 }
  0x37   :  { %127 = vmatmul.f32.gmra.mxu0 %v69_v39  ;;  %150 = vmatmul.f32.gmra.mxu1 %v69_v39 }
  0x38   :  { %264 = vmatpush.msra.mxu3 %v206_v1 }
  0xac   :  { %v125_v5 = vpop.f32.mrf.mxu0  ;;  %v148_v6 = vpop.f32.mrf.mxu1 }
  0xad   :  { %v126_v7 = vadd.f32 %v125_v5, %v104_v3  ;;  %v149_v8 = vadd.f32 %v148_v6, %v105_v4 }
  0xaf   :  { %v154_v9 = vmul.f32 %v126_v7, %v126_v7  ;;  %v155_v10 = vmul.f32 %v149_v8, %v149_v8 }
  0xb1   :  { %v158_v11 = vmul.f32 %v154_v9, %v126_v7  ;;  %v159_v12 = vmul.f32 %v155_v10, %v149_v8 }
  0xb3   :  { %v162_v13 = vmul.f32 0.044715, %v158_v11  ;;  %v163_v14 = vmul.f32 0.044715, %v159_v12 }
  0xb4   :  { %v128_v15 = vpop.f32.mrf.mxu0  ;;  %v151_v16 = vpop.f32.mrf.mxu1 }
  0xb5   :  { %v129_v17 = vadd.f32 %v128_v15, %v104_v3  ;;  %v152_v18 = vadd.f32 %v151_v16, %v105_v4  ;;  %v166_v19 = vadd.f32 %v162_v13, %v126_v7  ;;  %v167_v20 = vadd.f32 %v163_v14, %v149_v8 }
  0xb7   :  { %v156_v21 = vmul.f32 %v129_v17, %v129_v17  ;;  %v157_v22 = vmul.f32 %v152_v18, %v152_v18  ;;  %v170_v23 = vmul.f32 0.7978846, %v166_v19  ;;  %v171_v24 = vmul.f32 0.7978846, %v167_v20 }
  0xb9   :  { %v160_v25 = vmul.f32 %v156_v21, %v129_v17  ;;  %v161_v26 = vmul.f32 %v157_v22, %v152_v18  ;;  %303 = vtanh.f32 %v170_v23 }
  0xba   :  { %305 = vtanh.f32 %v171_v24 }
  0xbb   :  { %v164_v27 = vmul.f32 0.044715, %v160_v25  ;;  %v165_v28 = vmul.f32 0.044715, %v161_v26 }
  0xbd   :  { %v168_v29 = vadd.f32 %v164_v27, %v129_v17  ;;  %v169_v30 = vadd.f32 %v165_v28, %v152_v18 }
  0xbf   :  { %v304_v31 = vpop.eup %303  ;;  %v172_v32 = vmul.f32 0.7978846, %v168_v29  ;;  %v173_v33 = vmul.f32 0.7978846, %v169_v30 }
  0xc0   :  { %v306_v34 = vpop.eup %305  ;;  %v178_v35 = vadd.f32 1.0, %v304_v31 }
  0xc1   :  { %v179_v36 = vadd.f32 1.0, %v306_v34  ;;  %307 = vtanh.f32 %v172_v32 }
  0xc2   :  { %v182_v37 = vmul.f32 0.5, %v178_v35  ;;  %309 = vtanh.f32 %v173_v33 }
  0xc3   :  { %v183_v38 = vmul.f32 0.5, %v179_v36 }
  0xc4   :  { %v186_v39 = vmul.f32 %v182_v37, %v126_v7 }
  0xc5   :  { %v187_v40 = vmul.f32 %v183_v38, %v149_v8 }
  0xc6   :  { %242 = vmatmul.f32.vlgmr.msra.gmra.mxu2 %v186_v39 }
  0xc7   :  { %v308_v41 = vpop.eup %307  ;;  %265 = vmatmul.f32.vlgmr.msra.gmra.mxu3 %v187_v40 }
  0xc8   :  { %v310_v42 = vpop.eup %309  ;;  %v180_v43 = vadd.f32 1.0, %v308_v41 }
  0xc9   :  { %v181_v44 = vadd.f32 1.0, %v310_v42 }
  0xca   :  { %v184_v45 = vmul.f32 0.5, %v180_v43 }
  0xcb   :  { %v185_v46 = vmul.f32 0.5, %v181_v44 }
  0xcc   :  { %v188_v47 = vmul.f32 %v184_v45, %v129_v17 }
  0xcd   :  { %v189_v48 = vmul.f32 %v185_v46, %v152_v18 }
  0xce   :  { %245 = vmatmul.f32.gmra.mxu2 %v188_v47 }
  0xcf   :  { %268 = vmatmul.f32.gmra.mxu3 %v189_v48 }
 0x149   :  { %v243_v50 = vpop.f32.mrf.mxu2 }
 0x14a   :  { %v244_v51 = vadd.f32 %v302_v49, %v243_v50  ;;  %v266_v52 = vpop.f32.mrf.mxu3 }
 0x14c   :  { %v267_v53 = vadd.f32 %v266_v52, %v244_v51 }
 0x14e   :  { %272 = vst [vmem:[#allocation8] sm:$0xff] %v267_v53 }
 0x151   :  { %v246_v54 = vpop.f32.mrf.mxu2 }
 0x152   :  { %v247_v55 = vadd.f32 %v302_v49, %v246_v54  ;;  %v269_v56 = vpop.f32.mrf.mxu3 }
 0x154   :  { %v270_v57 = vadd.f32 %v269_v56, %v247_v55 }
 0x156   :  { %273 = vst [vmem:[#allocation8 + $0x8] sm:$0xff] %v270_v57 }
 0x157   :  { %286 = dma.vmem_to_hbm [thread:$0]  %s279_s13, 256, %s281_s16, [#allocation4], %s417_s30, %s417_s30, %s418_s6  }
 0x158   :  { %411 = dma.done.wait [#allocation4], 256  }
 0x159   :  { %412 = vsyncadd [#allocation4], 4294967040 }
 0x15a   :  { %291 = vsyncpa [#allocation3], 1 }
 0x15b   :  { %292 = vsyncpa [#allocation6], 1 }
 0x15c   :  { %293 = vsyncpa [#allocation4], 1 }

</bundles_post_ra>
